<compile_context>
chip_gen: v7x
topology: tpu7x:2x2x1
jax: 0.10.0
libtpu: 0.0.40
codegen_flags: <defaults>
</compile_context>

<pallas_src>
import jax
import jax.numpy as jnp
from jax.experimental import pallas as pl
from jax.experimental.pallas import tpu as pltpu


def _silu(x):
    return x * jax.nn.sigmoid(x)


def _gate_from_pooled(y, w1_ref, w2_ref, wb2_ref, eh_ref, rsum_ref,
                      w3a_ref, w3b_ref, bias_ref):
    """SE gate g = sigmoid(fc(y)) for pooled activations y of shape (TB, C).

    Implements (per row):
        h  = SiLU(y @ W1 + b1)                      # fc[0], fc[1]
        h  = h @ W2 + b2                            # fc[2]
        bl = sum_{i,j} h_i h_j Wb[i,j,:] + bb       # Bilinear (TRL) branch
        g  = sigmoid([SiLU(h), SiLU(bl)] @ W3 + b3) # Concater+SiLU+fc[5]+fc[6]
    The bilinear contraction is reshape-free: two d-length MXU contractions with
    precomputed 0/1 selection (eh) and group-sum (rsum) matrices.
    """
    d = w1_ref.shape[1]
    m = rsum_ref.shape[1]
    C = w3a_ref.shape[1]
    bias = bias_ref[...]                               # (1, 2d+m+C) packed [b1|b2|bb|b3]
    b1 = bias[:, 0:d]
    b2 = bias[:, d:2 * d]
    bb = bias[:, 2 * d:2 * d + m]
    b3 = bias[:, 2 * d + m:2 * d + m + C]

    h = _silu(jnp.dot(y, w1_ref[...], preferred_element_type=jnp.float32) + b1)   # (TB, d)
    h = jnp.dot(h, w2_ref[...], preferred_element_type=jnp.float32) + b2          # (TB, d)

    # t[b, j*m+k]  = sum_i h[b,i] Wb[i,j,k]   (wb2 = Wb flattened to (d, d*m))
    # hr[b, j*m+k] = h[b,j]                   (eh is a 0/1 repeat matrix (d, d*m))
    # bl[b, k]     = sum_j (t*hr)[b, j*m+k]   (rsum is a 0/1 group-sum matrix (d*m, m))
    t = jnp.dot(h, wb2_ref[...], preferred_element_type=jnp.float32)              # (TB, d*m)
    hr = jnp.dot(h, eh_ref[...], preferred_element_type=jnp.float32)              # (TB, d*m)
    bl = jnp.dot(t * hr, rsum_ref[...], preferred_element_type=jnp.float32) + bb  # (TB, m)

    # W3 is pre-split into its h-rows (w3a) and bl-rows (w3b): no lane concat needed.
    return jax.nn.sigmoid(
        jnp.dot(_silu(h), w3a_ref[...], preferred_element_type=jnp.float32)
        + jnp.dot(_silu(bl), w3b_ref[...], preferred_element_type=jnp.float32)
        + b3)                                                                      # (TB, C)


def se_complex_kernel_3d(x_ref, w1_ref, w2_ref, wb2_ref, eh_ref, rsum_ref,
                         w3a_ref, w3b_ref, bias_ref, out_ref):
    """Preferred path (L % 128 == 0): x/out blocks are (TB, C, L), L on lanes."""
    x = x_ref[...].astype(jnp.float32)                     # (TB, C, L)
    y = jnp.mean(x, axis=-1)                               # squeeze: lane-dim reduce (XLU)
    g = _gate_from_pooled(y, w1_ref, w2_ref, wb2_ref, eh_ref, rsum_ref,
                          w3a_ref, w3b_ref, bias_ref)      # (TB, C)
    out_ref[...] = (x * g[:, :, None]).astype(out_ref.dtype)   # excite: lane broadcast


def se_complex_kernel_flat(x_ref, pool_ref, bcast_ref, w1_ref, w2_ref, wb2_ref,
                           eh_ref, rsum_ref, w3a_ref, w3b_ref, bias_ref, out_ref):
    """Fallback path (small / odd L): lane-dense (TB, Npad) 2-D tiles; the squeeze
    and the gate broadcast are matmuls with small constant pool/bcast matrices."""
    x = x_ref[...].astype(jnp.float32)                                     # (TB, Np)
    y = jnp.dot(x, pool_ref[...], preferred_element_type=jnp.float32)      # (TB, C)
    g = _gate_from_pooled(y, w1_ref, w2_ref, wb2_ref, eh_ref, rsum_ref,
                          w3a_ref, w3b_ref, bias_ref)                      # (TB, C)
    gf = jnp.dot(g, bcast_ref[...], preferred_element_type=jnp.float32)    # (TB, Np)
    out_ref[...] = (x * gf).astype(out_ref.dtype)


def _vmem_limit_bytes():
    """~3/4 of physical VMEM, capped at 100 MiB: ~48 MiB on v7x, ~96 MiB on v5e/v6e."""
    cap = 64 * 1024 * 1024  # conservative fallback (v7x per-TC VMEM)
    try:
        cap = int(getattr(pltpu.get_tpu_info(), "vmem_capacity_bytes", cap))
    except Exception:
        pass
    return int(min(cap * 3 // 4, 100 * 1024 * 1024))


def _choose_tb(batch, row_bytes, const_bytes, vmem_limit, n_big):
    """Batch-tile rows per grid step, from a VMEM working-set budget.

    Working set ~= n_big tiles of (tb, row) I/O (double-buffered in/out plus
    intermediates) + double-buffered constants; solve for tb, round down to a
    multiple of 8, and keep >= 2 grid steps when the batch allows (v7x 2x TC).
    """
    budget = int(vmem_limit * 0.8) - 2 * const_bytes
    tb = budget // max(1, n_big * row_bytes)
    tb = max(8, (int(tb) // 8) * 8)
    if batch >= 16:
        tb = min(tb, max(8, (batch // 2) // 8 * 8))     # at least 2 grid steps
    tb = min(tb, max(8, ((batch + 7) // 8) * 8))        # never exceed padded batch
    return int(tb)


def se_layer_complex(x, params, *, tb=None, io_dtype=None):
    """x: (B, C, L). params: dict from init_params. Returns (B, C, L) in io_dtype
    (defaults to x.dtype). Pass io_dtype=jnp.bfloat16 to halve HBM traffic."""
    B, C, L = x.shape
    d = params["w1"].shape[1]
    m = params["wb"].shape[1]
    f32 = jnp.float32
    io_dtype = x.dtype if io_dtype is None else jnp.dtype(io_dtype)
    x = x.astype(io_dtype)
    itemsize = jnp.dtype(io_dtype).itemsize
    vmem_limit = _vmem_limit_bytes()

    # Grid-invariant gate weights (all tiny: O(d^2 m) floats).
    eh = jnp.repeat(jnp.eye(d, dtype=f32), m, axis=1)            # (d, d*m)
    rsum = jnp.tile(jnp.eye(m, dtype=f32), (d, 1))               # (d*m, m)
    wb2 = params["wb"].reshape(d, d * m).astype(f32)             # Wb[i,j,k] at (i, j*m+k)
    bias = jnp.concatenate([params["b1"], params["b2"],
                            params["bb"], params["b3"]], axis=1)  # (1, 2d+m+C)
    weights = (params["w1"], params["w2"], wb2, eh, rsum,
               params["w3a"], params["w3b"], bias)

    const2d = lambda a: pl.BlockSpec(a.shape, lambda i: (0, 0))   # grid-invariant block
    compiler_params = pltpu.CompilerParams(
        dimension_semantics=("parallel",), vmem_limit_bytes=vmem_limit)

    if L % 128 == 0:
        # ---- 3-D lane-dense path: (tb, C, L) blocks; no pool/bcast matmuls, no gf tile.
        const_bytes = sum(int(a.size) * 4 for a in weights)
        if tb is None:
            tb = _choose_tb(B, C * L * itemsize, const_bytes, vmem_limit, n_big=5)
        tb = max(8, (int(tb) // 8) * 8)
        Bp = ((B + tb - 1) // tb) * tb
        xp = jnp.pad(x, ((0, Bp - B), (0, 0), (0, 0))) if Bp != B else x
        out = pl.pallas_call(
            se_complex_kernel_3d,
            out_shape=jax.ShapeDtypeStruct((Bp, C, L), io_dtype),
            grid=(Bp // tb,),
            in_specs=[pl.BlockSpec((tb, C, L), lambda i: (i, 0, 0))]
                     + [const2d(a) for a in weights],
            out_specs=pl.BlockSpec((tb, C, L), lambda i: (i, 0, 0)),
            compiler_params=compiler_params,
        )(xp, *weights)
        return out[:B]

    # ---- Flattened path: (tb, Npad) blocks, Npad a multiple of 128 (unmasked vst).
    N = C * L
    Np = ((N + 127) // 128) * 128
    pool = jnp.repeat(jnp.eye(C, dtype=f32), L, axis=0) / float(L)   # (N, C): mean over L
    bcast = jnp.repeat(jnp.eye(C, dtype=f32), L, axis=1)             # (C, N): repeat gate
    if Np != N:
        pool = jnp.pad(pool, ((0, Np - N), (0, 0)))
        bcast = jnp.pad(bcast, ((0, 0), (0, Np - N)))
    consts = (pool, bcast) + weights
    const_bytes = sum(int(a.size) * 4 for a in consts)
    if tb is None:
        tb = _choose_tb(B, Np * itemsize, const_bytes, vmem_limit, n_big=6)
    tb = max(8, (int(tb) // 8) * 8)
    Bp = ((B + tb - 1) // tb) * tb
    xf = x.reshape(B, N)
    if Bp != B or Np != N:
        xf = jnp.pad(xf, ((0, Bp - B), (0, Np - N)))
    out = pl.pallas_call(
        se_complex_kernel_flat,
        out_shape=jax.ShapeDtypeStruct((Bp, Np), io_dtype),
        grid=(Bp // tb,),
        in_specs=[pl.BlockSpec((tb, Np), lambda i: (i, 0))]
                 + [const2d(a) for a in consts],
        out_specs=pl.BlockSpec((tb, Np), lambda i: (i, 0)),
        compiler_params=compiler_params,
    )(xf, *consts)
    return out[:B, :N].reshape(B, C, L)


def init_params(key, inp, oup, reduction=4):
    d = inp // reduction           # hidden width of the SE bottleneck
    m = d // 2                     # Bilinear output width
    ks = jax.random.split(key, 8)
    return {
        # Linear(oup, d): weight in (in, out) layout, bias
        "w1": jax.random.normal(ks[0], (oup, d), jnp.float32) * 0.1,
        "b1": jax.random.normal(ks[1], (1, d), jnp.float32) * 0.01,
        # Linear(d, d)
        "w2": jax.random.normal(ks[2], (d, d), jnp.float32) * 0.1,
        "b2": jax.random.normal(ks[3], (1, d), jnp.float32) * 0.01,
        # Bilinear TRL full weight (d, d, m) reconstructed (std=0.00075 as in the module),
        # flattened to (d*d, m); bias (1, m)
        "wb": jax.random.normal(ks[4], (d * d, m), jnp.float32) * 0.00075,
        "bb": jax.random.normal(ks[5], (1, m), jnp.float32) * 0.01,
        # Linear(d + m, oup), split into the part acting on h (d rows) and on bl (m rows)
        "w3a": jax.random.normal(ks[6], (d, oup), jnp.float32) * 0.1,
        "w3b": jax.random.normal(ks[7], (m, oup), jnp.float32) * 0.1,
        "b3": jnp.zeros((1, oup), jnp.float32),
    }


def se_layer_complex_ref(x, params):
    """Pure-JAX reference mirroring the PyTorch forward exactly."""
    y = jnp.mean(x, axis=2)                                   # (B, C)
    h = jax.nn.silu(y @ params["w1"] + params["b1"])
    h = h @ params["w2"] + params["b2"]
    op = jnp.einsum("bi,bj->bij", h, h).reshape(h.shape[0], -1)
    bl = op @ params["wb"] + params["bb"]
    z = jax.nn.silu(jnp.concatenate([h, bl], axis=-1))
    w3 = jnp.concatenate([params["w3a"], params["w3b"]], axis=0)
    g = jax.nn.sigmoid(z @ w3 + params["b3"])
    return x * g[:, :, None]


if __name__ == "__main__":
    # inp=32, oup=C=8, reduction=4 -> d=8, m=4 (consistent with the module).
    INP, OUP, RED = 32, 8, 4
    key = jax.random.PRNGKey(0)
    kx1, kx2, kp = jax.random.split(key, 3)
    params = init_params(kp, INP, OUP, RED)

    # (1) L % 128 == 0 -> 3-D lane-dense path (the preferred / production path).
    B, C, L = 16, OUP, 128
    x1 = jax.random.normal(kx1, (B, C, L), jnp.float32)
    out1 = jax.block_until_ready(se_layer_complex(x1, params))
    ref1 = se_layer_complex_ref(x1, params)
    assert out1.shape == (B, C, L)
    assert jnp.allclose(out1, ref1, rtol=1e-4, atol=1e-5), "3-D path mismatch vs reference"

    # (2) small L -> flattened lane-dense (B, C*L) fallback path.
    L2 = 16
    x2 = jax.random.normal(kx2, (B, C, L2), jnp.float32)
    out2 = jax.block_until_ready(se_layer_complex(x2, params))
    ref2 = se_layer_complex_ref(x2, params)
    assert out2.shape == (B, C, L2)
    assert jnp.allclose(out2, ref2, rtol=1e-4, atol=1e-5), "flat path mismatch vs reference"

    # (3) bf16 I/O (halves HBM traffic on this bandwidth-bound kernel); gate math stays f32.
    out_bf = jax.block_until_ready(se_layer_complex(x1, params, io_dtype=jnp.bfloat16))
    assert out_bf.dtype == jnp.bfloat16
    assert jnp.allclose(out_bf.astype(jnp.float32), ref1, rtol=5e-2, atol=5e-2), \
        "bf16 path mismatch vs reference"

    print("KERNEL_OK")
</pallas_src>

<mosaic_0001>
module attributes {stable_mosaic.version = 11 : i64} {
  func.func @se_complex_kernel_3d(%arg0: i32, %arg1: memref<8x8x128xf32, #tpu.memory_space<vmem>>, %arg2: memref<8x8xf32, #tpu.memory_space<vmem>>, %arg3: memref<8x8xf32, #tpu.memory_space<vmem>>, %arg4: memref<8x32xf32, #tpu.memory_space<vmem>>, %arg5: memref<8x32xf32, #tpu.memory_space<vmem>>, %arg6: memref<32x4xf32, #tpu.memory_space<vmem>>, %arg7: memref<8x8xf32, #tpu.memory_space<vmem>>, %arg8: memref<4x8xf32, #tpu.memory_space<vmem>>, %arg9: memref<1x28xf32, #tpu.memory_space<vmem>>, %arg10: memref<8x8x128xf32, #tpu.memory_space<vmem>>) attributes {dimension_semantics = [#tpu.dimension_semantics<parallel>], iteration_bounds = array<i64: 2>, scalar_prefetch = 0 : i64, scratch_operands = 0 : i64, tpu.core_type = #tpu.core_type<tc>, window_params = [{transform_indices = @transform_0, window_bounds = array<i64: 8, 8, 128>}, {pipeline_mode = #tpu.pipeline_mode<synchronous>, transform_indices = @transform_1, window_bounds = array<i64: 8, 8>}, {pipeline_mode = #tpu.pipeline_mode<synchronous>, transform_indices = @transform_2, window_bounds = array<i64: 8, 8>}, {pipeline_mode = #tpu.pipeline_mode<synchronous>, transform_indices = @transform_3, window_bounds = array<i64: 8, 32>}, {pipeline_mode = #tpu.pipeline_mode<synchronous>, transform_indices = @transform_4, window_bounds = array<i64: 8, 32>}, {pipeline_mode = #tpu.pipeline_mode<synchronous>, transform_indices = @transform_5, window_bounds = array<i64: 32, 4>}, {pipeline_mode = #tpu.pipeline_mode<synchronous>, transform_indices = @transform_6, window_bounds = array<i64: 8, 8>}, {pipeline_mode = #tpu.pipeline_mode<synchronous>, transform_indices = @transform_7, window_bounds = array<i64: 4, 8>}, {pipeline_mode = #tpu.pipeline_mode<synchronous>, transform_indices = @transform_8, window_bounds = array<i64: 1, 28>}, {transform_indices = @transform_9, window_bounds = array<i64: 8, 8, 128>}]} {
    %c0 = arith.constant 0 : index
    %c0_0 = arith.constant 0 : index
    %c0_1 = arith.constant 0 : index
    %0 = vector.load %arg1[%c0, %c0_0, %c0_1] : memref<8x8x128xf32, #tpu.memory_space<vmem>>, vector<8x8x128xf32>
    %cst = arith.constant dense<0.000000e+00> : vector<8x8xf32>
    %1 = vector.multi_reduction <add>, %0, %cst [2] : vector<8x8x128xf32> to vector<8x8xf32>
    %cst_2 = arith.constant 1.280000e+02 : f32
    %2 = vector.broadcast %cst_2 : f32 to vector<8x8xf32>
    %3 = arith.divf %1, %2 : vector<8x8xf32>
    %c0_3 = arith.constant 0 : index
    %c0_4 = arith.constant 0 : index
    %4 = vector.load %arg9[%c0_3, %c0_4] : memref<1x28xf32, #tpu.memory_space<vmem>>, vector<1x28xf32>
    %5 = vector.extract_strided_slice %4 {offsets = [0, 0], sizes = [1, 8], strides = [1, 1]} : vector<1x28xf32> to vector<1x8xf32>
    %6 = vector.extract_strided_slice %4 {offsets = [0, 8], sizes = [1, 8], strides = [1, 1]} : vector<1x28xf32> to vector<1x8xf32>
    %7 = vector.extract_strided_slice %4 {offsets = [0, 16], sizes = [1, 4], strides = [1, 1]} : vector<1x28xf32> to vector<1x4xf32>
    %8 = vector.extract_strided_slice %4 {offsets = [0, 20], sizes = [1, 8], strides = [1, 1]} : vector<1x28xf32> to vector<1x8xf32>
    %c0_5 = arith.constant 0 : index
    %c0_6 = arith.constant 0 : index
    %9 = vector.load %arg2[%c0_5, %c0_6] : memref<8x8xf32, #tpu.memory_space<vmem>>, vector<8x8xf32>
    %cst_7 = arith.constant dense<0.000000e+00> : vector<8x8xf32>
    %10 = tpu.matmul %3, %9, %cst_7 {dimension_numbers = #tpu.dot_dimension_numbers<[1], [0], [0], [1], [0, 0, 1, 1], [], []>} : vector<8x8xf32>, vector<8x8xf32>, vector<8x8xf32> -> vector<8x8xf32>
    %11 = vector.broadcast %5 : vector<1x8xf32> to vector<8x8xf32>
    %12 = arith.addf %10, %11 : vector<8x8xf32>
    %13 = arith.negf %12 : vector<8x8xf32>
    %14 = math.exp %13 : vector<8x8xf32>
    %cst_8 = arith.constant 1.000000e+00 : f32
    %15 = vector.broadcast %cst_8 : f32 to vector<8x8xf32>
    %16 = arith.addf %15, %14 : vector<8x8xf32>
    %17 = arith.divf %15, %16 : vector<8x8xf32>
    %18 = arith.mulf %12, %17 : vector<8x8xf32>
    %c0_9 = arith.constant 0 : index
    %c0_10 = arith.constant 0 : index
    %19 = vector.load %arg3[%c0_9, %c0_10] : memref<8x8xf32, #tpu.memory_space<vmem>>, vector<8x8xf32>
    %cst_11 = arith.constant dense<0.000000e+00> : vector<8x8xf32>
    %20 = tpu.matmul %18, %19, %cst_11 {dimension_numbers = #tpu.dot_dimension_numbers<[1], [0], [0], [1], [0, 0, 1, 1], [], []>} : vector<8x8xf32>, vector<8x8xf32>, vector<8x8xf32> -> vector<8x8xf32>
    %21 = vector.broadcast %6 : vector<1x8xf32> to vector<8x8xf32>
    %22 = arith.addf %20, %21 : vector<8x8xf32>
    %c0_12 = arith.constant 0 : index
    %c0_13 = arith.constant 0 : index
    %23 = vector.load %arg4[%c0_12, %c0_13] : memref<8x32xf32, #tpu.memory_space<vmem>>, vector<8x32xf32>
    %cst_14 = arith.constant dense<0.000000e+00> : vector<8x32xf32>
    %24 = tpu.matmul %22, %23, %cst_14 {dimension_numbers = #tpu.dot_dimension_numbers<[1], [0], [0], [1], [0, 0, 1, 1], [], []>} : vector<8x8xf32>, vector<8x32xf32>, vector<8x32xf32> -> vector<8x32xf32>
    %c0_15 = arith.constant 0 : index
    %c0_16 = arith.constant 0 : index
    %25 = vector.load %arg5[%c0_15, %c0_16] : memref<8x32xf32, #tpu.memory_space<vmem>>, vector<8x32xf32>
    %cst_17 = arith.constant dense<0.000000e+00> : vector<8x32xf32>
    %26 = tpu.matmul %22, %25, %cst_17 {dimension_numbers = #tpu.dot_dimension_numbers<[1], [0], [0], [1], [0, 0, 1, 1], [], []>} : vector<8x8xf32>, vector<8x32xf32>, vector<8x32xf32> -> vector<8x32xf32>
    %27 = arith.mulf %24, %26 : vector<8x32xf32>
    %c0_18 = arith.constant 0 : index
    %c0_19 = arith.constant 0 : index
    %28 = vector.load %arg6[%c0_18, %c0_19] : memref<32x4xf32, #tpu.memory_space<vmem>>, vector<32x4xf32>
    %cst_20 = arith.constant dense<0.000000e+00> : vector<8x4xf32>
    %29 = tpu.matmul %27, %28, %cst_20 {dimension_numbers = #tpu.dot_dimension_numbers<[1], [0], [0], [1], [0, 0, 1, 1], [], []>} : vector<8x32xf32>, vector<32x4xf32>, vector<8x4xf32> -> vector<8x4xf32>
    %30 = vector.broadcast %7 : vector<1x4xf32> to vector<8x4xf32>
    %31 = arith.addf %29, %30 : vector<8x4xf32>
    %32 = arith.negf %22 : vector<8x8xf32>
    %33 = math.exp %32 : vector<8x8xf32>
    %cst_21 = arith.constant 1.000000e+00 : f32
    %34 = vector.broadcast %cst_21 : f32 to vector<8x8xf32>
    %35 = arith.addf %34, %33 : vector<8x8xf32>
    %36 = arith.divf %34, %35 : vector<8x8xf32>
    %37 = arith.mulf %22, %36 : vector<8x8xf32>
    %c0_22 = arith.constant 0 : index
    %c0_23 = arith.constant 0 : index
    %38 = vector.load %arg7[%c0_22, %c0_23] : memref<8x8xf32, #tpu.memory_space<vmem>>, vector<8x8xf32>
    %cst_24 = arith.constant dense<0.000000e+00> : vector<8x8xf32>
    %39 = tpu.matmul %37, %38, %cst_24 {dimension_numbers = #tpu.dot_dimension_numbers<[1], [0], [0], [1], [0, 0, 1, 1], [], []>} : vector<8x8xf32>, vector<8x8xf32>, vector<8x8xf32> -> vector<8x8xf32>
    %40 = arith.negf %31 : vector<8x4xf32>
    %41 = math.exp %40 : vector<8x4xf32>
    %cst_25 = arith.constant 1.000000e+00 : f32
    %42 = vector.broadcast %cst_25 : f32 to vector<8x4xf32>
    %43 = arith.addf %42, %41 : vector<8x4xf32>
    %44 = arith.divf %42, %43 : vector<8x4xf32>
    %45 = arith.mulf %31, %44 : vector<8x4xf32>
    %c0_26 = arith.constant 0 : index
    %c0_27 = arith.constant 0 : index
    %46 = vector.load %arg8[%c0_26, %c0_27] : memref<4x8xf32, #tpu.memory_space<vmem>>, vector<4x8xf32>
    %cst_28 = arith.constant dense<0.000000e+00> : vector<8x8xf32>
    %47 = tpu.matmul %45, %46, %cst_28 {dimension_numbers = #tpu.dot_dimension_numbers<[1], [0], [0], [1], [0, 0, 1, 1], [], []>} : vector<8x4xf32>, vector<4x8xf32>, vector<8x8xf32> -> vector<8x8xf32>
    %48 = arith.addf %39, %47 : vector<8x8xf32>
    %49 = vector.broadcast %8 : vector<1x8xf32> to vector<8x8xf32>
    %50 = arith.addf %48, %49 : vector<8x8xf32>
    %51 = arith.negf %50 : vector<8x8xf32>
    %52 = math.exp %51 : vector<8x8xf32>
    %cst_29 = arith.constant 1.000000e+00 : f32
    %53 = vector.broadcast %cst_29 : f32 to vector<8x8xf32>
    %54 = arith.addf %53, %52 : vector<8x8xf32>
    %55 = arith.divf %53, %54 : vector<8x8xf32>
    %56 = vector.shape_cast %55 : vector<8x8xf32> to vector<8x8x1xf32>
    %57 = vector.broadcast %56 : vector<8x8x1xf32> to vector<8x8x128xf32>
    %58 = arith.mulf %0, %57 : vector<8x8x128xf32>
    %c0_30 = arith.constant 0 : index
    %c0_31 = arith.constant 0 : index
    %c0_32 = arith.constant 0 : index
    %59 = vector.load %arg10[%c0_30, %c0_31, %c0_32] : memref<8x8x128xf32, #tpu.memory_space<vmem>>, vector<8x8x128xf32>
    tpu.vector_store %arg10[%c0_30, %c0_31, %c0_32], %58 {strides = array<i32>} : memref<8x8x128xf32, #tpu.memory_space<vmem>>, vector<8x8x128xf32>,
    return
  }
  func.func @transform_0(%arg0: i32) -> (i32, i32, i32) {
    %c0_i32 = arith.constant 0 : i32
    %c0_i32_0 = arith.constant 0 : i32
    %c0_i32_1 = arith.constant 0 : i32
    return %arg0, %c0_i32, %c0_i32_0 : i32, i32, i32
  }
  func.func @transform_1(%arg0: i32) -> (i32, i32) {
    %c0_i32 = arith.constant 0 : i32
    %c0_i32_0 = arith.constant 0 : i32
    %c0_i32_1 = arith.constant 0 : i32
    return %c0_i32, %c0_i32_0 : i32, i32
  }
  func.func @transform_2(%arg0: i32) -> (i32, i32) {
    %c0_i32 = arith.constant 0 : i32
    %c0_i32_0 = arith.constant 0 : i32
    %c0_i32_1 = arith.constant 0 : i32
    return %c0_i32, %c0_i32_0 : i32, i32
  }
  func.func @transform_3(%arg0: i32) -> (i32, i32) {
    %c0_i32 = arith.constant 0 : i32
    %c0_i32_0 = arith.constant 0 : i32
    %c0_i32_1 = arith.constant 0 : i32
    return %c0_i32, %c0_i32_0 : i32, i32
  }
  func.func @transform_4(%arg0: i32) -> (i32, i32) {
    %c0_i32 = arith.constant 0 : i32
    %c0_i32_0 = arith.constant 0 : i32
    %c0_i32_1 = arith.constant 0 : i32
    return %c0_i32, %c0_i32_0 : i32, i32
  }
  func.func @transform_5(%arg0: i32) -> (i32, i32) {
    %c0_i32 = arith.constant 0 : i32
    %c0_i32_0 = arith.constant 0 : i32
    %c0_i32_1 = arith.constant 0 : i32
    return %c0_i32, %c0_i32_0 : i32, i32
  }
  func.func @transform_6(%arg0: i32) -> (i32, i32) {
    %c0_i32 = arith.constant 0 : i32
    %c0_i32_0 = arith.constant 0 : i32
    %c0_i32_1 = arith.constant 0 : i32
    return %c0_i32, %c0_i32_0 : i32, i32
  }
  func.func @transform_7(%arg0: i32) -> (i32, i32) {
    %c0_i32 = arith.constant 0 : i32
    %c0_i32_0 = arith.constant 0 : i32
    %c0_i32_1 = arith.constant 0 : i32
    return %c0_i32, %c0_i32_0 : i32, i32
  }
  func.func @transform_8(%arg0: i32) -> (i32, i32) {
    %c0_i32 = arith.constant 0 : i32
    %c0_i32_0 = arith.constant 0 : i32
    %c0_i32_1 = arith.constant 0 : i32
    return %c0_i32, %c0_i32_0 : i32, i32
  }
  func.func @transform_9(%arg0: i32) -> (i32, i32, i32) {
    %c0_i32 = arith.constant 0 : i32
    %c0_i32_0 = arith.constant 0 : i32
    %c0_i32_1 = arith.constant 0 : i32
    return %arg0, %c0_i32, %c0_i32_0 : i32, i32, i32
  }
}

</mosaic_0001>

<bundles_post_ra>
// kernel: tpu_custom_call.1
= control target key start
LH: loop header
LB: loop body
LE: loop exit
PB: predicated region body
PF: predicated region fallthrough
CT: control target
= control target key end

     0   :  { %14 = vsyncpa [#allocation3], 0  ;;  %s1762_s0 = inlined_call_operand.hbm [shape: f32[16,8,128], index: 0, kind: input, shape index: {}]   ;;  %s1763_s1 = inlined_call_operand.vmem [shape: f32[8,8], index: 1, kind: input, shape index: {}]   ;;  %s1764_s2 = inlined_call_operand.vmem [shape: f32[8,8], index: 2, kind: input, shape index: {}]   ;;  %s1765_s3 = inlined_call_operand.vmem [shape: f32[8,32], index: 3, kind: input, shape index: {}]   ;;  %s1766_s4 = inlined_call_operand.vmem [shape: f32[8,32], index: 4, kind: input, shape index: {}]   ;;  %s1767_s5 = inlined_call_operand.vmem [shape: f32[32,4], index: 5, kind: input, shape index: {}]   ;;  %s1768_s6 = inlined_call_operand.vmem [shape: f32[8,8], index: 6, kind: input, shape index: {}]   ;;  %s1769_s7 = inlined_call_operand.vmem [shape: f32[4,8], index: 7, kind: input, shape index: {}]   ;;  %s1770_s8 = inlined_call_operand.vmem [shape: f32[1,28], index: 8, kind: input, shape index: {}]   ;;  %s1771_s9 = inlined_call_operand.hbm [shape: f32[16,8,128], index: 9, kind: output, shape index: {}]  }
   0x1   :  { %16 = vsyncpa [#allocation3 + $0x1], 0 }
   0x2   :  { %17 = vsyncpa [#allocation4], 0 }
   0x3   :  { %19 = vsyncpa [#allocation4 + $0x1], 0  ;;  %s1495_s30 = smov 0   ;;  %s1497_s10 = smov 0  }
   0x4   :  { %s1499_s11 = smov 0   ;;  %s1501_s12 = smov 0  }
   0x5 LB: > { %s1516_s13 = sadd.s32 4294967295, %s1431_s12   ;;  %s1170_s14 = sadd.s32 4294967294, %s1431_s12   ;;  %s1431_s12 = sphi %s1501_s12, %s1784_s12   ;;  %s1427_s11 = sphi %s1499_s11, %s1783_s11   ;;  %s1423_s10 = sphi %s1497_s10, %s1782_s10   ;;  %s1419_s30 = sphi %s1495_s30, %s1781_s30  }
   0x6   : > { %s1520_s15 = sadd.s32 1, %s1431_s12   ;;  %s32_s16 = sadd.s32 1, %s1427_s11 }
   0x7   : > { %s29_s17 = ssub.s32 %s1431_s12, %s1520_s15  ;;  %p39_p0 = scmp.ne.s32.totalorder %s1427_s11, %s1423_s10 }
   0x8   : > { %p30_p1 = scmp.eq.s32.totalorder %s29_s17, 0  ;;  %p40_p2 = scmp.eq.s32.totalorder %s1431_s12, 0 }
   0x9   : > { %p45_p3 = scmp.ne.s32.totalorder %s1423_s10, %s1419_s30  ;;  %p46_p4 = scmp.eq.s32.totalorder %s1516_s13, 0 }
   0xa   : > { %s1532_s18 = scalar_select %p30_p1, %s1427_s11, %s32_s16  }
   0xb   : > { %p1534_p5 = por %p40_p2, %p39_p0  ;;  %p1538_p6 = por %p46_p4, %p45_p3 }
   0xc   : > { %p237_p7 = scmp.eq.s32.totalorder %s1516_s13, 1  ;;  %p243_p8 = scmp.eq.s32.totalorder %s1170_s14, 1 }
   0xd   : > { %p1275_p10 = scmp.lt.s32.totalorder %s1431_s12, 2  ;;  %s287_s23 = sand.u32 1, %s1427_s11  }
   0xe   : > { %p1545_p11 = por %p237_p7, %p39_p0  ;;  %p1549_p12 = por %p243_p8, %p45_p3 }
   0xf   : > { %s1197_s24 = sshll.u32 %s1431_s12, 10  ;;  %s1173_s25 = sshll.u32 %s287_s23, 6 }
  0x10   : > { %s1775_s21 = scalar_select %p1545_p11, 1, 0 }
  0x11   : > { %s1776_s22 = scalar_select %p1549_p12, 1, 0 }
  0x12   : > { %s1558_s28 = scalar_lea.hbm %s1762_s0, %s1197_s24  ;;  %s291_s29 = scalar_lea.vmem [#allocation2], %s1173_s25 }
  0x13   : > { %s298_s14 = sshll.u32 %s291_s29, 4  ;;  %p1562_p13 = pnand %p1275_p10, %p1534_p5  ;;  %s1566_s14 = int_to_ptr.vmem [resolvable:$true] %s298_s14 }
  0x14   : > { %s1568_s17 = scalar_lea.sflag [#allocation3], %s287_s23  ;;  %s1335_s26 = scalar_lea.hbm %s1558_s28, 1024 }
  0x15   : > { %p1336_p0 = scmp.ne.s32.totalorder %s1558_s28, %s1335_s26  ;;  %p1337_p1 = pneg %p1562_p13 }
  0x16   : > { %s1340_s25 = scalar_lea.hbm %s1762_s0, 2048  ;;  %p1341_p4 = scmp.lt.u32.totalorder %s1558_s28, %s1762_s0 }
  0x17   : > { %p1338_p2 = pnand %p1337_p1, %p1336_p0  ;;  %p1342_p5 = scmp.lt.u32.totalorder %s1340_s25, %s1335_s26 }
  0x18   : > { %p1344_p8 = scmp.lt.u32.totalorder %s1335_s26, %s1558_s28 }
  0x19   : > { %p1339_p3 = pneg %p1338_p2  ;;  %p1343_p7 = por %p1342_p5, %p1341_p4 }
  0x1b   : > { %p1345_p10 = por %p1344_p8, %p1343_p7 }
  0x1d   : > { %p1346_p9 = pnand %p1345_p10, %p1339_p3 }
  0x1f   : > { %1349 = shalt.err (!%p1346_p9)
}
  0x20   : > { %s1350_s23 = scalar_lea.vmem %s1566_s14, 1024  ;;  %s1433_s24 = smov [#allocation2]  }
  0x21   : > { %p1351_p0 = scmp.ne.s32.totalorder %s1566_s14, %s1350_s23  ;;  %s1355_s19 = sshll.u32 %s1433_s24, 4  ;;  %s1356_s19 = int_to_ptr.vmem [resolvable:$false] %s1355_s19 }
  0x22   : > { %s1357_s27 = scalar_lea.vmem %s1356_s19, 2048  ;;  %p1358_p11 = scmp.lt.s32.totalorder %s1566_s14, %s1356_s19 }
  0x23   : > { %p1353_p2 = pnand %p1351_p0, %p1337_p1  ;;  %p1359_p4 = scmp.lt.s32.totalorder %s1357_s27, %s1350_s23 }
  0x25   : > { %p1354_p12 = pneg %p1353_p2  ;;  %p1360_p5 = por %p1359_p4, %p1358_p11 }
  0x27   : > { %p1361_p7 = pnand %p1360_p5, %p1354_p12 }
  0x29   : > { %1364 = shalt.err (!%p1361_p7)
}
  0x2a   : > { %s1434_s26 = smov 128   ;;  %s1435_s25 = smov 8  }
  0x2b   : > { %1270 = dma.hbm_to_vmem [thread:$0]  (!%p1562_p13), %s1558_s28, 1024, %s1566_s14, %s1568_s17, %s1434_s26, %s1434_s26, %s1435_s25  }
  0x2c   : > { %p1176_p9 = scmp.ge.s32.totalorder %s1431_s12, 1  ;;  %p306_p1 = scmp.lt.s32.totalorder %s1431_s12, 3 }
  0x2e   : > { %p307_p3 = pnand %p1176_p9, %p306_p1 }
  0x2f   : > { %s1599_s29 = sand.u32 (!%p307_p3), 1, %s1423_s10  }
  0x30   : > { %310 = sbr.rel (%p307_p3) target bundleno = 1521 (0x5f1), region = 56  ;;  %s1177_s23 = sshll.u32 (!%p307_p3), %s1599_s29, 6 }
  0x31   : > { %s313_s24 = scalar_lea.sflag (!%p307_p3), [#allocation3], %s1599_s29  ;;  %s316_s19 = scalar_lea.vmem (!%p307_p3), [#allocation2], %s1177_s23 }
  0x37   : > { %1410 = dma.done.wait (%p1538_p6), %s313_s24, 1024  }
  0x38   : > { %1412 = vsyncadd (%p1538_p6), %s313_s24, 4294966272  ;;  %v1609_v0 = vld [vmem:[%s316_s19] sm:$0xff]  ;;  %v1611_v1 = vld [vmem:[%s316_s19 + $0x10] sm:$0xff]  ;;  %v1436_v9 = vmov 0.0   ;;  %vm1437_vm0 = vmmov 0   ;;  %v402_v10 = vlaneseq  ;;  %vm436_vm1 = vcmask 1041409  }
  0x39   : > { %361 = vadd.xlane.f32.xlu0 %v1609_v0  ;;  %365 = vadd.xlane.f32.xlu1 %v1611_v1  ;;  %v1615_v2 = vld [vmem:[%s316_s19 + $0x8] sm:$0xff]  ;;  %v1617_v3 = vld [vmem:[%s316_s19 + $0x18] sm:$0xff]  ;;  %v1621_v4 = vld [vmem:[%s316_s19 + $0x20] sm:$0xff]  ;;  %vm438_vm2 = vcmask 1042434   ;;  %vm440_vm3 = vcmask 1043459   ;;  %vm442_vm4 = vcmask 1044484  }
  0x3a   : > { %v1623_v5 = vld [vmem:[%s316_s19 + $0x28] sm:$0xff]  ;;  %v1627_v6 = vld [vmem:[%s316_s19 + $0x30] sm:$0xff]  ;;  %v1629_v7 = vld [vmem:[%s316_s19 + $0x38] sm:$0xff]  ;;  %1216 = vmatprep.subr.mxu0 %v1436_v9  ;;  %1218 = vmatprep.mubr.msk.f32.mxu0 %vm1437_vm0, %v1436_v9  ;;  %v403_v11 = vand.u32 127, %v402_v10  ;;  %v1643_v12 = vshrl.u32 %v402_v10, 7  ;;  %vm444_vm5 = vcmask 1045509  }
  0x3b   : > { %v387_v8 = vld [vmem:[%s1763_s1] sm:$0xff]  ;;  %1221 = vmatprep.subr.mxu1 %v1436_v9  ;;  %1223 = vmatprep.mubr.msk.f32.mxu1 %vm1437_vm0, %v1436_v9  ;;  %vm446_vm6 = vcmask 1046534   ;;  %vm448_vm7 = vcmask 1047559   ;;  %vm450_vm8 = vcmask 64512   ;;  %s1438_s24 = smov 120   ;;  %v1439_v57 = vmov 0.0|0.0  }
  0x3c   : > { %1217 = vmatpush3.msra.mxu0 %v387_v8  ;;  %v406_v15 = vsub.s32 %v403_v11, %v1643_v12  ;;  %v530_v45 = vld [vmem:[%s1764_s2] sm:$0xff]  ;;  %v754_v59 = vld [vmem:[%s1767_s5 + $0x8] sm:$0xff]  ;;  %v755_v10 = vld [vmem:[%s1767_s5 + $0x10] sm:$0xff]  ;;  %s1440_s19 = smov 112   ;;  %vm760_vm9 = vcmask 261120   ;;  %vm854_vm10 = vcmask 1043456  }
  0x3d   : > { %363 = vadd.xlane.f32.xlu0 %v1615_v2  ;;  %367 = vadd.xlane.f32.xlu1 %v1617_v3  ;;  %v1179_v46 = vld [vmem:[%s1770_s8] ss:$0 sm:$0xff]  ;;  %v756_v11 = vld [vmem:[%s1767_s5 + $0x18] sm:$0xff]  ;;  %s1441_s14 = smov 108   ;;  %vm850_vm11 = vcmask 31744   ;;  %s350_s27 = scalar_lea.vmem [#allocation5], %s1177_s23 }
  0x3e   : > { %1226 = vmatprep.subr.mxu0 %v1436_v9  ;;  %1222 = vmatpush3.msra.mxu1 %v530_v45  ;;  %v607_v47 = vld [vmem:[%s1765_s3] sm:$0xff]  ;;  %v1020_v45 = vsub.s32 1, %v1643_v12  ;;  %s1097_s26 = sshll.u32 %s350_s27, 4  ;;  %s1198_s23 = sshll.u32 %s1516_s13, 10  ;;  %s1711_s26 = int_to_ptr.vmem [resolvable:$true] %s1097_s26 }
  0x3f   : > { %1231 = vmatprep.subr.mxu1 %v1436_v9  ;;  %v681_v56 = vld [vmem:[%s1766_s4] sm:$0xff]  ;;  %s1084_s13 = scalar_lea.sflag [#allocation4], %s1599_s29  ;;  %s1365_s20 = scalar_lea.vmem %s1711_s26, 1024 }
  0x40   : > { %v753_v58 = vld [vmem:[%s1767_s5] sm:$0xff]  ;;  %p1366_p6 = scmp.ne.s32.totalorder %s1711_s26, %s1365_s20  ;;  %p1778_p11 = scmp.ne.s32.totalorder %s1775_s21, 0 }
  0x41   : > { %369 = vadd.xlane.f32.xlu0 %v1621_v4  ;;  %371 = vadd.xlane.f32.xlu1 %v1623_v5  ;;  %v1258_v62 = vpack.c.bf16 %v754_v59, %v753_v58  ;;  %v1055_v58 = vsub.s32 6, %v1643_v12  ;;  %s1442_s28 = smov [#allocation5]  }
  0x42   : > { %p1367_p12 = pnand %p1366_p6, %p1778_p11 }
  0x44   : > { %p1368_p13 = pneg %p1367_p12 }
  0x45   : > { %373 = vadd.xlane.f32.xlu0 %v1627_v6  ;;  %375 = vadd.xlane.f32.xlu1 %v1629_v7 }
  0x56   : > { %757 = vrot.lane.b32.xlu1 %v1179_v46, %s1440_s19  ;;  %s1716_s19 = scalar_lea.hbm %s1771_s9, %s1198_s23 }
  0x5a   : > { %1001 = vrot.lane.b32.xlu1 %v1179_v46, %s1441_s14  ;;  %s1369_s14 = sshll.u32 %s1442_s28, 4  ;;  %s1370_s14 = int_to_ptr.vmem [resolvable:$false] %s1369_s14 }
  0x5b   : > { %531 = vrot.lane.b32.xlu0 %v1179_v46, %s1438_s24  ;;  %s1371_s16 = scalar_lea.vmem %s1370_s14, 2048  ;;  %p1372_p8 = scmp.lt.s32.totalorder %s1711_s26, %s1370_s14 }
  0x5c   : > { %p1373_p10 = scmp.lt.s32.totalorder %s1371_s16, %s1365_s20 }
  0x5e   : > { %p1374_p0 = por %p1373_p10, %p1372_p8 }
  0x60   : > { %p1375_p2 = pnand %p1374_p0, %p1368_p13 }
  0xc6   : > { %v362_v13 = vpop.xlane.xlu0 %361  ;;  %v366_v14 = vpop.xlane.xlu1 %365 }
  0xc7   : > { %v378_v16 = vmul.f32 0.0078125, %v362_v13  ;;  %v380_v17 = vmul.f32 0.0078125, %v366_v14  ;;  %v1261_v13 = vpack.c.bf16 %v756_v11, %v755_v10 }
  0xc9   : > { %v407_v22 = vrot.slane %v378_v16, %v406_v15  ;;  %v415_v25 = vrot.slane %v380_v17, %v406_v15 }
  0xca   : > { %v364_v18 = vpop.xlane.xlu0 %363  ;;  %v368_v19 = vpop.xlane.xlu1 %367 }
  0xcb   : > { %v379_v20 = vmul.f32 0.0078125, %v364_v18  ;;  %v381_v21 = vmul.f32 0.0078125, %v368_v19  ;;  %v849_v19 = vld [vmem:[%s1769_s7] sm:$0xf] }
  0xcd   : > { %v411_v23 = vrot.slane %v379_v20, %v406_v15  ;;  %v419_v24 = vrot.slane %v381_v21, %v406_v15 }
  0xce   : > { %v370_v26 = vpop.xlane.xlu0 %369  ;;  %v372_v27 = vpop.xlane.xlu1 %371 }
  0xcf   : > { %v437_v28 = vsel %vm436_vm1, %v411_v23, %v407_v22  ;;  %v382_v29 = vmul.f32 0.0078125, %v370_v26  ;;  %v383_v30 = vmul.f32 0.0078125, %v372_v27 }
  0xd0   : > { %v439_v31 = vsel %vm438_vm2, %v415_v25, %v437_v28 }
  0xd1   : > { %v441_v32 = vsel %vm440_vm3, %v419_v24, %v439_v31  ;;  %v423_v33 = vrot.slane %v382_v29, %v406_v15  ;;  %v427_v34 = vrot.slane %v383_v30, %v406_v15 }
  0xd2   : > { %v374_v35 = vpop.xlane.xlu0 %373  ;;  %v376_v36 = vpop.xlane.xlu1 %375 }
  0xd3   : > { %v443_v37 = vsel %vm442_vm4, %v423_v33, %v441_v32  ;;  %v384_v38 = vmul.f32 0.0078125, %v374_v35  ;;  %v385_v39 = vmul.f32 0.0078125, %v376_v36  ;;  %v841_v32 = vld [vmem:[%s1768_s6] sm:$0xff] }
  0xd4   : > { %v445_v42 = vsel %vm444_vm5, %v427_v34, %v443_v37 }
  0xd5   : > { %v431_v40 = vrot.slane %v384_v38, %v406_v15  ;;  %v435_v41 = vrot.slane %v385_v39, %v406_v15 }
  0xd6   : > { %v532_v60 = vpop.permute.xlu0 %531  ;;  %v758_v20 = vpop.permute.xlu1 %757 }
  0xd7   : > { %v447_v43 = vsel %vm446_vm6, %v431_v40, %v445_v42 }
  0xd8   : > { %v449_v44 = vsel %vm448_vm7, %v435_v41, %v447_v43 }
  0xd9   : > { %1219 = vmatmul.mubr.msk.f32.vlgmr.msra.gmra.mrb[0].mxu0 %vm450_vm8, %v449_v44 }
  0xda   : > { %1228 = vmatprep.mubr.msk.f32.mxu0 %vm1437_vm0, %v1436_v9  ;;  %1227 = vmatpush3.msra.mxu0 %v607_v47  ;;  %v1002_v38 = vpop.permute.xlu1 %1001 }
  0xdb   : > { %1257 = vmatprep.subr.bf16.mxu0 %v1439_v57 }
 0x1ac   : > { %v519_v48 = vpop.f32.mrb[0].mxu0 }
 0x1ad   : > { %v520_v49 = vadd.f32 %v1179_v46, %v519_v48  ;;  %v1220_v50 = vpop.f32.mrb[1].mxu0  ;;  %v1013_v46 = vsub.s32 0, %v1643_v12 }
 0x1ae   : > { %v1027_v50 = vsub.s32 2, %v1643_v12 }
 0x1af   : > { %v1181_v51 = vmul.f32 -1.442695, %v520_v49 }
 0x1b1   : > { %1319 = vpow2.f32 %v1181_v51 }
 0x1bb   : > { %v1320_v52 = vpop.eup %1319 }
 0x1bc   : > { %v526_v53 = vadd.f32 1.0, %v1320_v52 }
 0x1be   : > { %1321 = vrcp.f32 %v526_v53  ;;  %v1048_v53 = vsub.s32 5, %v1643_v12 }
 0x1c8   : > { %v1322_v54 = vpop.eup %1321 }
 0x1c9   : > { %v529_v55 = vmul.f32 %v1322_v54, %v520_v49  ;;  %v1034_v49 = vsub.s32 3, %v1643_v12  ;;  %v1041_v54 = vsub.s32 4, %v1643_v12 }
 0x1cb   : > { %1224 = vmatmul.mubr.msk.f32.vlgmr.msra.gmra.mrb[0].mxu1 %vm450_vm8, %v529_v55 }
 0x1cc   : > { %1232 = vmatpush3.msra.mxu1 %v681_v56  ;;  %1233 = vmatprep.mubr.msk.f32.mxu1 %vm1437_vm0, %v1436_v9 }
 0x1cd   : > { %1247 = vmatprep.subr.mxu1 %v1436_v9 }
 0x29e   : > { %v603_v61 = vpop.f32.mrb[0].mxu1 }
 0x29f   : > { %v604_v63 = vadd.f32 %v603_v61, %v532_v60  ;;  %v1225_v8 = vpop.f32.mrb[1].mxu1 }
 0x2a1   : > { %1229 = vmatmul.mubr.msk.f32.vlgmr.msra.gmra.mrb[2].mxu0 %vm450_vm8, %v604_v63  ;;  %1234 = vmatmul.mubr.msk.f32.vlgmr.msra.gmra.mrb[2].mxu1 %vm450_vm8, %v604_v63  ;;  %v1186_v21 = vmul.f32 -1.442695, %v604_v63 }
 0x2a2   : > { %1259 = vmatpush3.bf16.msra.mxu0 %v1258_v62  ;;  %1244 = vmatprep.mubr.msk.f32.mxu0 %vm1437_vm0, %v1436_v9 }
 0x2a3   : > { %1260 = vmatprep.subr.bf16.mxu0 %v1439_v57  ;;  %1249 = vmatprep.mubr.msk.f32.mxu1 %vm1437_vm0, %v1436_v9  ;;  %1323 = vpow2.f32 %v1186_v21  ;;  %v1062_v57 = vsub.s32 7, %v1643_v12 }
 0x2a4   : > { %1248 = vmatpush3.msk.msra.mxu1 %vm854_vm10, %v849_v19 }
 0x2a5   : > { %1252 = vmatprep.subr.mxu1 %v1436_v9 }
 0x2a6   : > { %1262 = vmatpush3.bf16.msra.mxu0 %v1261_v13 }
 0x2ad   : > { %v1324_v26 = vpop.eup %1323 }
 0x2ae   : > { %v837_v28 = vadd.f32 1.0, %v1324_v26 }
 0x374   : > { %v677_v14 = vpop.f32.mrb[2].mxu0  ;;  %v748_v15 = vpop.f32.mrb[2].mxu1 }
 0x375   : > { %v752_v16 = vmul.f32 %v748_v15, %v677_v14  ;;  %v1230_v17 = vpop.f32.mrb[3].mxu0  ;;  %v1235_v18 = vpop.f32.mrb[3].mxu1 }
 0x377   : > { %1245 = vmatmul.mubr.msk.f32.vlgmr.msra.gmra.mrb[4].mxu0 %vm760_vm9, %v752_v16 }
 0x44a   : > { %v830_v22 = vpop.f32.mrb[4].mxu0 }
 0x44b   : > { %v831_v23 = vadd.f32 %v830_v22, %v758_v20  ;;  %v1246_v24 = vpop.f32.mrb[5].mxu0 }
 0x44d   : > { %v1187_v25 = vmul.f32 -1.442695, %v831_v23 }
 0x44f   : > { %1325 = vpow2.f32 %v1187_v25 }
 0x459   : > { %v1326_v27 = vpop.eup %1325 }
 0x45a   : > { %v845_v29 = vadd.f32 1.0, %v1326_v27 }
 0x45c   : > { %1327 = vrcp.f32 %v845_v29 }
 0x45d   : > { %1329 = vrcp.f32 %v837_v28 }
 0x466   : > { %v1328_v30 = vpop.eup %1327 }
 0x467   : > { %v848_v31 = vmul.f32 %v1328_v30, %v831_v23  ;;  %v1330_v33 = vpop.eup %1329 }
 0x468   : > { %v840_v34 = vmul.f32 %v1330_v33, %v604_v63 }
 0x469   : > { %1250 = vmatmul.mubr.msk.f32.vlgmr.msra.gmra.mrb[4].mxu1 %vm850_vm11, %v848_v31 }
 0x46a   : > { %1253 = vmatpush3.msra.mxu1 %v841_v32  ;;  %1254 = vmatprep.mubr.msk.f32.mxu1 %vm1437_vm0, %v1436_v9 }
 0x46d   : > { %1255 = vmatmul.mubr.msk.f32.vlgmr.msra.gmra.mrb[6].mxu1 %vm450_vm8, %v840_v34 }
 0x53c   : > { %v924_v35 = vpop.f32.mrb[4].mxu1 }
 0x53d   : > { %v1251_v36 = vpop.f32.mrb[5].mxu1 }
 0x540   : > { %v997_v37 = vpop.f32.mrb[6].mxu1 }
 0x541   : > { %v998_v39 = vadd.f32 %v997_v37, %v924_v35  ;;  %v1256_v40 = vpop.f32.mrb[7].mxu1 }
 0x543   : > { %v1004_v41 = vadd.f32 %v1002_v38, %v998_v39 }
 0x545   : > { %v1191_v42 = vmul.f32 -1.442695, %v1004_v41 }
 0x547   : > { %1331 = vpow2.f32 %v1191_v42 }
 0x551   : > { %v1332_v43 = vpop.eup %1331 }
 0x552   : > { %v1008_v44 = vadd.f32 1.0, %v1332_v43 }
 0x554   : > { %1333 = vrcp.f32 %v1008_v44 }
 0x55e   : > { %v1334_v9 = vpop.eup %1333 }
 0x55f   : > { %v1021_v47 = vrot.slane %v1334_v9, %v1020_v45  ;;  %v1014_v48 = vrot.slane %v1334_v9, %v1013_v46  ;;  %v1035_v51 = vrot.slane %v1334_v9, %v1034_v49  ;;  %v1028_v52 = vrot.slane %v1334_v9, %v1027_v50 }
 0x560   : > { %v1049_v55 = vrot.slane %v1334_v9, %v1048_v53  ;;  %v1042_v56 = vrot.slane %v1334_v9, %v1041_v54  ;;  %v1063_v59 = vrot.slane %v1334_v9, %v1062_v57  ;;  %v1056_v60 = vrot.slane %v1334_v9, %v1055_v58 }
 0x561   : > { %1023 = vbcast.lane.b32.xlu0 %v1021_v47, 256  ;;  %1016 = vbcast.lane.b32.xlu1 %v1014_v48, 256 }
 0x565   : > { %1037 = vbcast.lane.b32.xlu0 %v1035_v51, 256  ;;  %1030 = vbcast.lane.b32.xlu1 %v1028_v52, 256 }
 0x569   : > { %1051 = vbcast.lane.b32.xlu0 %v1049_v55, 256  ;;  %1044 = vbcast.lane.b32.xlu1 %v1042_v56, 256 }
 0x56d   : > { %1065 = vbcast.lane.b32.xlu0 %v1063_v59, 256  ;;  %1058 = vbcast.lane.b32.xlu1 %v1056_v60, 256 }
 0x5d3   : > { %v1024_v61 = vpop.permute.xlu0 %1023  ;;  %v1017_v62 = vpop.permute.xlu1 %1016 }
 0x5d4   : > { %v1068_v63 = vmul.f32 %v1024_v61, %v1615_v2  ;;  %v1067_v8 = vmul.f32 %v1017_v62, %v1609_v0 }
 0x5d6   : > { %1076 = vst [vmem:[%s350_s27 + $0x8] sm:$0xff] %v1068_v63  ;;  %1075 = vst [vmem:[%s350_s27] sm:$0xff] %v1067_v8 }
 0x5d7   : > { %v1038_v10 = vpop.permute.xlu0 %1037  ;;  %v1031_v11 = vpop.permute.xlu1 %1030 }
 0x5d8   : > { %v1070_v12 = vmul.f32 %v1038_v10, %v1617_v3  ;;  %v1069_v13 = vmul.f32 %v1031_v11, %v1611_v1 }
 0x5da   : > { %1078 = vst [vmem:[%s350_s27 + $0x18] sm:$0xff] %v1070_v12  ;;  %1077 = vst [vmem:[%s350_s27 + $0x10] sm:$0xff] %v1069_v13 }
 0x5db   : > { %v1052_v14 = vpop.permute.xlu0 %1051  ;;  %v1045_v15 = vpop.permute.xlu1 %1044 }
 0x5dc   : > { %v1072_v2 = vmul.f32 %v1052_v14, %v1623_v5  ;;  %v1071_v0 = vmul.f32 %v1045_v15, %v1621_v4 }
 0x5de   : > { %1080 = vst [vmem:[%s350_s27 + $0x28] sm:$0xff] %v1072_v2  ;;  %1079 = vst [vmem:[%s350_s27 + $0x20] sm:$0xff] %v1071_v0 }
 0x5df   : > { %v1066_v3 = vpop.permute.xlu0 %1065  ;;  %v1059_v1 = vpop.permute.xlu1 %1058 }
 0x5e0   : > { %v1074_v5 = vmul.f32 %v1066_v3, %v1629_v7  ;;  %v1073_v16 = vmul.f32 %v1059_v1, %v1627_v6 }
 0x5e2   : > { %1082 = vst [vmem:[%s350_s27 + $0x38] sm:$0xff] %v1074_v5  ;;  %1081 = vst [vmem:[%s350_s27 + $0x30] sm:$0xff] %v1073_v16 }
 0x5e3   : > { %1378 = shalt.err (!%p1375_p2)
}
 0x5e4   : > { %s1379_s17 = scalar_lea.hbm %s1716_s19, 1024  ;;  %s1383_s25 = scalar_lea.hbm %s1771_s9, 2048 }
 0x5e5   : > { %p1380_p4 = scmp.ne.s32.totalorder %s1716_s19, %s1379_s17  ;;  %p1384_p9 = scmp.lt.u32.totalorder %s1716_s19, %s1771_s9 }
 0x5e6   : > { %p1385_p1 = scmp.lt.u32.totalorder %s1383_s25, %s1379_s17  ;;  %p1387_p6 = scmp.lt.u32.totalorder %s1379_s17, %s1716_s19 }
 0x5e7   : > { %p1381_p5 = pnand %p1380_p4, %p1778_p11 }
 0x5e8   : > { %p1386_p3 = por %p1385_p1, %p1384_p9 }
 0x5e9   : > { %p1382_p7 = pneg %p1381_p5 }
 0x5ea   : > { %p1388_p12 = por %p1387_p6, %p1386_p3 }
 0x5ec   : > { %p1389_p13 = pnand %p1388_p12, %p1382_p7 }
 0x5ee   : > { %1392 = shalt.err (!%p1389_p13)
}
 0x5ef   : > { %s1443_s20 = smov 128   ;;  %s1444_s14 = smov 8  }
 0x5f0   : > { %1265 = dma.vmem_to_hbm [thread:$0]  (%p1778_p11), %s1711_s26, 1024, %s1716_s19, %s1084_s13, %s1443_s20, %s1443_s20, %s1444_s14  }
 0x5f1 PF: > { %s1112_s16 = sand.u32 1, %s1419_s30   ;;  %p1779_p8 = scmp.ne.s32.totalorder %s1776_s22, 0 }
 0x5f2   : > { %p1780_p10 = scmp.ge.s32.totalorder %s1431_s12, 2  ;;  %s1113_s17 = scalar_lea.sflag [#allocation4], %s1112_s16 }
 0x5f4   : > { %p1272_p0 = pnand %p1780_p10, %p1779_p8 }
 0x5f6   : > { %1414 = dma.done.wait (!%p1272_p0), %s1113_s17, 1024  }
 0x5f7   : > { %1416 = vsyncadd (!%p1272_p0), %s1113_s17, 4294966272  ;;  %p22_p2 = scmp.ge.s32.totalorder %s1520_s15, 4   ;;  %s1781_s30 = smov %s1423_s10 }
 0x5f8   : > { %s1782_s10 = smov %s1427_s11  ;;  %s1783_s11 = smov %s1532_s18 }
 0x5f9   : > { %s1784_s12 = smov %s1520_s15  ;;  %24 = sbr.rel (!%p22_p2) target bundleno = 5 (0x5), region = 101 }
 0x600   :  { %1118 = vsyncpa [#allocation3], 1 }
 0x601   :  { %1120 = vsyncpa [#allocation3 + $0x1], 1 }
 0x602   :  { %1121 = vsyncpa [#allocation4], 1 }
 0x603   :  { %1123 = vsyncpa [#allocation4 + $0x1], 1 }

</bundles_post_ra>
